<compile_context>
chip_gen: v7x
topology: tpu7x:2x2x1
jax: 0.10.0
libtpu: 0.0.40
codegen_flags: <defaults>
</compile_context>

<pallas_src>
import jax
import jax.numpy as jnp
from jax.experimental import pallas as pl
from jax.experimental.pallas import tpu as pltpu

EPS = 1e-6
DROPOUT_P = 0.1


def _sublayer_connection_kernel(x_ref, mask_ref, a2_ref, w_ref, bias_ref, o_ref):
    """One (TR, D) row tile: LayerNorm -> dense sublayer -> dropout -> residual."""
    x = x_ref[...].astype(jnp.float32)                        # (TR, D)
    d = x.shape[-1]

    # ---- LayerNorm (torch-style: unbiased std, eps added to the std) ----
    mean = jnp.mean(x, axis=-1, keepdims=True)
    xc = x - mean
    var_unbiased = jnp.sum(xc * xc, axis=-1, keepdims=True) * (1.0 / (d - 1))
    inv = 1.0 / (jnp.sqrt(var_unbiased) + EPS)                # (TR, 1) — tiny per-row divide
    normed = (a2_ref[...] * xc) * inv                         # b_2 folded into bias below

    # ---- sublayer: dense D -> D on the MXU (bf16 operands, f32 accumulate) ----
    sub = jnp.dot(normed.astype(jnp.bfloat16), w_ref[...],
                  preferred_element_type=jnp.float32)
    sub = sub + bias_ref[...]                                 # bias' = b_2 @ W + bias

    # ---- dropout: pre-scaled keep mask with values in {0, 1/(1-p)} ----
    sub = sub * mask_ref[...]

    # ---- residual add (re-read x_ref so the f32 upcast isn't live across the matmul) ----
    o_ref[...] = (x_ref[...].astype(jnp.float32) + sub).astype(o_ref.dtype)


def _pick_row_tile(rows):
    """Largest power-of-two row tile (multiple of 8) that evenly divides `rows`."""
    for tr in (1024, 512, 256, 128, 64, 32, 16, 8):
        if rows % tr == 0:
            return tr
    return rows


def sublayer_connection(x, a2, b2, w, bias, *, dropout_key, dropout_p=DROPOUT_P):
    """x: (B, S, D) float32 -> (B, S, D). Fused pre-LN + dense sublayer + dropout + residual."""
    B, S, D = x.shape
    R = B * S
    TR = _pick_row_tile(R)
    grid = (R // TR,)

    x2 = x.reshape(R, D)
    a2_2 = a2.reshape(1, D).astype(jnp.float32)
    # Fold the LayerNorm shift b_2 through the linear sublayer:
    #   (a*xhat + b2) @ W + b == (a*xhat) @ W + (b2 @ W + b)
    bias_eff = (jnp.dot(b2.astype(jnp.float32), w.astype(jnp.float32))
                + bias.astype(jnp.float32)).reshape(1, D)
    w_bf16 = w.astype(jnp.bfloat16)                           # VMEM-resident, half footprint

    # Inverted-dropout keep mask, pre-scaled so the kernel does a single multiply.
    keep_p = 1.0 - dropout_p
    mask = (jax.random.bernoulli(dropout_key, keep_p, (R, D)).astype(jnp.float32) / keep_p)
    # TODO(synk): on real TPU the mask could be generated in-kernel with
    # pltpu.prng_seed(seed + pl.program_id(0)) + pltpu.prng_random_bits to save the extra
    # R*D HBM stream, but those primitives have no interpret/CPU lowering.

    # Rough double-buffered VMEM footprint; only raise the scoped limit when needed.
    tile_bytes = TR * D * 4
    vmem_needed = 3 * 2 * tile_bytes + 2 * D * D * 2 + 4 * D * 4
    vmem_limit = None
    if 2 * vmem_needed > 32 * 1024 * 1024:
        vmem_limit = min(2 * vmem_needed, 64 * 1024 * 1024)

    cost = pl.CostEstimate(
        flops=2 * R * D * D + 10 * R * D,
        transcendentals=R,                                    # one sqrt per row
        bytes_accessed=3 * R * D * 4 + D * D * 2 + 3 * D * 4,
    )

    row_spec = pl.BlockSpec((TR, D), lambda i: (i, 0))
    const_vec = pl.BlockSpec((1, D), lambda i: (0, 0))

    out = pl.pallas_call(
        _sublayer_connection_kernel,
        out_shape=jax.ShapeDtypeStruct((R, D), x.dtype),
        grid=grid,
        in_specs=[
            row_spec,                                         # x tile
            row_spec,                                         # dropout keep-mask tile
            const_vec,                                        # a_2 (resident)
            pl.BlockSpec((D, D), lambda i: (0, 0)),           # sublayer weight (resident, bf16)
            const_vec,                                        # fused bias (resident)
        ],
        out_specs=row_spec,
        compiler_params=pltpu.CompilerParams(
            dimension_semantics=("parallel",),                # megacore sharding on v7x
            vmem_limit_bytes=vmem_limit,
        ),
        cost_estimate=cost,
    )(x2, mask, a2_2, w_bf16, bias_eff)

    return out.reshape(B, S, D)


if __name__ == "__main__":
    B, S, D = 2, 8, 128   # batch, seq, hidden (hidden = `size` in SublayerConnection)

    key = jax.random.PRNGKey(0)
    kx, kw, kb, kd = jax.random.split(key, 4)

    x = jax.random.normal(kx, (B, S, D), dtype=jnp.float32)

    # LayerNorm params exactly as in __init__: ones / zeros.
    a2 = jnp.ones((D,), dtype=jnp.float32)
    b2 = jnp.zeros((D,), dtype=jnp.float32)

    # Deterministic synthetic sublayer (dense D -> D).
    w = jax.random.normal(kw, (D, D), dtype=jnp.float32) * (1.0 / jnp.sqrt(D))
    bias = jax.random.normal(kb, (D,), dtype=jnp.float32) * 0.01

    out = sublayer_connection(x, a2, b2, w, bias, dropout_key=kd, dropout_p=DROPOUT_P)
    jax.block_until_ready(out)
    assert out.shape == (B, S, D) and out.dtype == jnp.float32

    # Pure-JAX reference with the identical dropout mask (same key/shape -> same draw).
    keep_p = 1.0 - DROPOUT_P
    mask_ref = (jax.random.bernoulli(kd, keep_p, (B * S, D)).astype(jnp.float32)
                / keep_p).reshape(B, S, D)
    xf = x.astype(jnp.float32)
    mean = xf.mean(-1, keepdims=True)
    xc = xf - mean
    std = jnp.sqrt((xc * xc).sum(-1, keepdims=True) / (D - 1))
    normed = a2 * xc / (std + EPS) + b2
    sub = jnp.dot(normed.astype(jnp.bfloat16), w.astype(jnp.bfloat16),
                  preferred_element_type=jnp.float32) + bias
    ref = xf + sub * mask_ref

    assert jnp.allclose(out, ref, atol=2e-2, rtol=2e-2), \
        float(jnp.max(jnp.abs(out - ref)))
    print("KERNEL_OK")
</pallas_src>

<mosaic_0001>
module attributes {stable_mosaic.version = 11 : i64} {
  func.func @_sublayer_connection_kernel(%arg0: i32, %arg1: memref<16x128xf32, #tpu.memory_space<vmem>>, %arg2: memref<16x128xf32, #tpu.memory_space<vmem>>, %arg3: memref<1x128xf32, #tpu.memory_space<vmem>>, %arg4: memref<128x128xbf16, #tpu.memory_space<vmem>>, %arg5: memref<1x128xf32, #tpu.memory_space<vmem>>, %arg6: memref<16x128xf32, #tpu.memory_space<vmem>>) attributes {dimension_semantics = [#tpu.dimension_semantics<parallel>], iteration_bounds = array<i64: 1>, scalar_prefetch = 0 : i64, scratch_operands = 0 : i64, tpu.core_type = #tpu.core_type<tc>, window_params = [{transform_indices = @transform_0, window_bounds = array<i64: 16, 128>}, {transform_indices = @transform_1, window_bounds = array<i64: 16, 128>}, {pipeline_mode = #tpu.pipeline_mode<synchronous>, transform_indices = @transform_2, window_bounds = array<i64: 1, 128>}, {pipeline_mode = #tpu.pipeline_mode<synchronous>, transform_indices = @transform_3, window_bounds = array<i64: 128, 128>}, {pipeline_mode = #tpu.pipeline_mode<synchronous>, transform_indices = @transform_4, window_bounds = array<i64: 1, 128>}, {transform_indices = @transform_5, window_bounds = array<i64: 16, 128>}]} {
    %c0 = arith.constant 0 : index
    %c0_0 = arith.constant 0 : index
    %0 = vector.load %arg1[%c0, %c0_0] : memref<16x128xf32, #tpu.memory_space<vmem>>, vector<16x128xf32>
    %cst = arith.constant dense<0.000000e+00> : vector<16xf32>
    %1 = vector.multi_reduction <add>, %0, %cst [1] : vector<16x128xf32> to vector<16xf32>
    %2 = vector.shape_cast %1 : vector<16xf32> to vector<16x1xf32>
    %cst_1 = arith.constant 1.280000e+02 : f32
    %3 = vector.broadcast %cst_1 : f32 to vector<16x1xf32>
    %4 = arith.divf %2, %3 : vector<16x1xf32>
    %5 = vector.broadcast %4 : vector<16x1xf32> to vector<16x128xf32>
    %6 = arith.subf %0, %5 : vector<16x128xf32>
    %7 = arith.mulf %6, %6 : vector<16x128xf32>
    %cst_2 = arith.constant dense<0.000000e+00> : vector<16xf32>
    %8 = vector.multi_reduction <add>, %7, %cst_2 [1] : vector<16x128xf32> to vector<16xf32>
    %9 = vector.shape_cast %8 : vector<16xf32> to vector<16x1xf32>
    %cst_3 = arith.constant 0.00787401571 : f32
    %10 = vector.broadcast %cst_3 : f32 to vector<16x1xf32>
    %11 = arith.mulf %9, %10 : vector<16x1xf32>
    %12 = math.sqrt %11 : vector<16x1xf32>
    %cst_4 = arith.constant 9.99999997E-7 : f32
    %13 = vector.broadcast %cst_4 : f32 to vector<16x1xf32>
    %14 = arith.addf %12, %13 : vector<16x1xf32>
    %cst_5 = arith.constant 1.000000e+00 : f32
    %15 = vector.broadcast %cst_5 : f32 to vector<16x1xf32>
    %16 = arith.divf %15, %14 : vector<16x1xf32>
    %c0_6 = arith.constant 0 : index
    %c0_7 = arith.constant 0 : index
    %17 = vector.load %arg3[%c0_6, %c0_7] : memref<1x128xf32, #tpu.memory_space<vmem>>, vector<1x128xf32>
    %18 = vector.broadcast %17 : vector<1x128xf32> to vector<16x128xf32>
    %19 = arith.mulf %18, %6 : vector<16x128xf32>
    %20 = vector.broadcast %16 : vector<16x1xf32> to vector<16x128xf32>
    %21 = arith.mulf %19, %20 : vector<16x128xf32>
    %22 = arith.truncf %21 : vector<16x128xf32> to vector<16x128xbf16>
    %c0_8 = arith.constant 0 : index
    %c0_9 = arith.constant 0 : index
    %23 = vector.load %arg4[%c0_8, %c0_9] : memref<128x128xbf16, #tpu.memory_space<vmem>>, vector<128x128xbf16>
    %cst_10 = arith.constant dense<0.000000e+00> : vector<16x128xf32>
    %24 = tpu.matmul %22, %23, %cst_10 {dimension_numbers = #tpu.dot_dimension_numbers<[1], [0], [0], [1], [0, 0, 1, 1], [], []>} : vector<16x128xbf16>, vector<128x128xbf16>, vector<16x128xf32> -> vector<16x128xf32>
    %c0_11 = arith.constant 0 : index
    %c0_12 = arith.constant 0 : index
    %25 = vector.load %arg5[%c0_11, %c0_12] : memref<1x128xf32, #tpu.memory_space<vmem>>, vector<1x128xf32>
    %26 = vector.broadcast %25 : vector<1x128xf32> to vector<16x128xf32>
    %27 = arith.addf %24, %26 : vector<16x128xf32>
    %c0_13 = arith.constant 0 : index
    %c0_14 = arith.constant 0 : index
    %28 = vector.load %arg2[%c0_13, %c0_14] : memref<16x128xf32, #tpu.memory_space<vmem>>, vector<16x128xf32>
    %29 = arith.mulf %27, %28 : vector<16x128xf32>
    %c0_15 = arith.constant 0 : index
    %c0_16 = arith.constant 0 : index
    %30 = vector.load %arg1[%c0_15, %c0_16] : memref<16x128xf32, #tpu.memory_space<vmem>>, vector<16x128xf32>
    %31 = arith.addf %30, %29 : vector<16x128xf32>
    %c0_17 = arith.constant 0 : index
    %c0_18 = arith.constant 0 : index
    %32 = vector.load %arg6[%c0_17, %c0_18] : memref<16x128xf32, #tpu.memory_space<vmem>>, vector<16x128xf32>
    tpu.vector_store %arg6[%c0_17, %c0_18], %31 {strides = array<i32>} : memref<16x128xf32, #tpu.memory_space<vmem>>, vector<16x128xf32>,
    return
  }
  func.func @transform_0(%arg0: i32) -> (i32, i32) {
    %c0_i32 = arith.constant 0 : i32
    %c0_i32_0 = arith.constant 0 : i32
    return %arg0, %c0_i32 : i32, i32
  }
  func.func @transform_1(%arg0: i32) -> (i32, i32) {
    %c0_i32 = arith.constant 0 : i32
    %c0_i32_0 = arith.constant 0 : i32
    return %arg0, %c0_i32 : i32, i32
  }
  func.func @transform_2(%arg0: i32) -> (i32, i32) {
    %c0_i32 = arith.constant 0 : i32
    %c0_i32_0 = arith.constant 0 : i32
    %c0_i32_1 = arith.constant 0 : i32
    return %c0_i32, %c0_i32_0 : i32, i32
  }
  func.func @transform_3(%arg0: i32) -> (i32, i32) {
    %c0_i32 = arith.constant 0 : i32
    %c0_i32_0 = arith.constant 0 : i32
    %c0_i32_1 = arith.constant 0 : i32
    return %c0_i32, %c0_i32_0 : i32, i32
  }
  func.func @transform_4(%arg0: i32) -> (i32, i32) {
    %c0_i32 = arith.constant 0 : i32
    %c0_i32_0 = arith.constant 0 : i32
    %c0_i32_1 = arith.constant 0 : i32
    return %c0_i32, %c0_i32_0 : i32, i32
  }
  func.func @transform_5(%arg0: i32) -> (i32, i32) {
    %c0_i32 = arith.constant 0 : i32
    %c0_i32_0 = arith.constant 0 : i32
    return %arg0, %c0_i32 : i32, i32
  }
}

</mosaic_0001>

<bundles_post_ra>
// kernel: tpu_custom_call.1
= control target key start
LH: loop header
LB: loop body
LE: loop exit
PB: predicated region body
PF: predicated region fallthrough
CT: control target
= control target key end

     0   :  { %10 = vsyncpa [#allocation3], 0  ;;  %s531_s0 = inlined_call_operand.hbm [shape: f32[16,128], index: 0, kind: input, shape index: {}]   ;;  %s532_s1 = inlined_call_operand.hbm [shape: f32[16,128], index: 1, kind: input, shape index: {}]   ;;  %s533_s2 = inlined_call_operand.vmem [shape: f32[1,128], index: 2, kind: input, shape index: {}]   ;;  %s534_s3 = inlined_call_operand.hbm [shape: bf16[128,128], index: 3, kind: input, shape index: {}]   ;;  %s535_s4 = inlined_call_operand.vmem [shape: f32[1,128], index: 4, kind: input, shape index: {}]   ;;  %s536_s5 = inlined_call_operand.hbm [shape: f32[16,128], index: 5, kind: output, shape index: {}]  }
   0x1   :  { %11 = vsyncpa [#allocation6], 0 }
   0x2   :  { %12 = vsyncpa [#allocation4], 0  ;;  %s411_s18 = smov [#allocation5]   ;;  %s412_s20 = smov [#allocation2]  }
   0x3   :  { %s30_s19 = sshll.u32 %s411_s18, 4  ;;  %s18_s21 = sshll.u32 %s412_s20, 4  ;;  %s31_s19 = int_to_ptr.vmem [resolvable:$true] %s30_s19  ;;  %s451_s21 = int_to_ptr.vmem [resolvable:$true] %s18_s21 }
   0x4   :  { %s317_s24 = scalar_lea.hbm %s532_s1, 256 }
   0x5   :  { %p318_p0 = scmp.ne.s32.totalorder %s532_s1, %s317_s24  ;;  %p321_p1 = scmp.lt.u32.totalorder %s317_s24, %s532_s1 }
   0x7   :  { %p323_p2 = pnand %p321_p1, %p318_p0 }
   0x9   :  { %326 = shalt.err (!%p323_p2)
}
   0xa   :  { %s327_s29 = scalar_lea.vmem %s31_s19, 256  ;;  %p332_p4 = scmp.lt.s32.totalorder %s31_s19, %s31_s19 }
   0xb   :  { %p328_p3 = scmp.ne.s32.totalorder %s31_s19, %s327_s29  ;;  %p333_p5 = scmp.lt.s32.totalorder %s327_s29, %s327_s29 }
   0xd   :  { %p334_p6 = por %p333_p5, %p332_p4 }
   0xf   :  { %p335_p7 = pnand %p334_p6, %p328_p3 }
  0x11   :  { %338 = shalt.err (!%p335_p7)
}
  0x12   :  { %s413_s30 = smov 128   ;;  %s414_s6 = smov 8  }
  0x13   :  { %36 = dma.hbm_to_vmem [thread:$0]  %s532_s1, 256, %s31_s19, [#allocation6], %s413_s30, %s413_s30, %s414_s6  }
  0x14   :  { %s339_s11 = scalar_lea.hbm %s531_s0, 256 }
  0x15   :  { %p340_p8 = scmp.ne.s32.totalorder %s531_s0, %s339_s11  ;;  %p343_p9 = scmp.lt.u32.totalorder %s339_s11, %s531_s0 }
  0x17   :  { %p345_p10 = pnand %p343_p9, %p340_p8 }
  0x19   :  { %348 = shalt.err (!%p345_p10)
}
  0x1a   :  { %s349_s16 = scalar_lea.vmem %s451_s21, 256  ;;  %p354_p12 = scmp.lt.s32.totalorder %s451_s21, %s451_s21 }
  0x1b   :  { %p350_p11 = scmp.ne.s32.totalorder %s451_s21, %s349_s16  ;;  %p355_p13 = scmp.lt.s32.totalorder %s349_s16, %s349_s16 }
  0x1d   :  { %p356_p0 = por %p355_p13, %p354_p12 }
  0x1f   :  { %p357_p1 = pnand %p356_p0, %p350_p11 }
  0x21   :  { %360 = shalt.err (!%p357_p1)
}
  0x22   :  { %24 = dma.hbm_to_vmem [thread:$0]  %s531_s0, 256, %s451_s21, [#allocation3], %s413_s30, %s413_s30, %s414_s6  }
  0x23   :  { %s415_s18 = smov [#allocation7]   ;;  %s361_s23 = scalar_lea.hbm %s534_s3, 1024 }
  0x24   :  { %s44_s19 = sshll.u32 %s415_s18, 4  ;;  %p362_p2 = scmp.ne.s32.totalorder %s534_s3, %s361_s23  ;;  %s45_s19 = int_to_ptr.vmem [resolvable:$true] %s44_s19 }
  0x25   :  { %p365_p3 = scmp.lt.u32.totalorder %s361_s23, %s534_s3 }
  0x27   :  { %p367_p4 = pnand %p365_p3, %p362_p2 }
  0x29   :  { %370 = shalt.err (!%p367_p4)
}
  0x2a   :  { %s371_s28 = scalar_lea.vmem %s45_s19, 1024  ;;  %p376_p6 = scmp.lt.s32.totalorder %s45_s19, %s45_s19 }
  0x2b   :  { %p372_p5 = scmp.ne.s32.totalorder %s45_s19, %s371_s28  ;;  %p377_p7 = scmp.lt.s32.totalorder %s371_s28, %s371_s28 }
  0x2d   :  { %p378_p8 = por %p377_p7, %p376_p6 }
  0x2f   :  { %p379_p9 = pnand %p378_p8, %p372_p5 }
  0x31   :  { %382 = shalt.err (!%p379_p9)
}
  0x32   :  { %s416_s0 = smov 64   ;;  %s417_s21 = smov 4  }
  0x33   :  { %50 = dma.hbm_to_vmem [thread:$0]  %s534_s3, 1024, %s45_s19, [#allocation6], %s416_s0, %s416_s0, %s417_s21  }
  0x34   :  { %405 = dma.done.wait [#allocation3], 256  }
  0x35   :  { %406 = vsyncadd [#allocation3], 4294967040 }
  0x36   :  { %407 = dma.done.wait [#allocation6], 1280  }
  0x37   :  { %408 = vsyncadd [#allocation6], 4294966016  ;;  %v500_v0 = vld [vmem:[#allocation2] sm:$0xff]  ;;  %v502_v1 = vld [vmem:[#allocation2 + $0x8] sm:$0xff]  ;;  %v418_v11 = vmov 0.0   ;;  %vm419_vm0 = vmmov 0  }
  0x38   :  { %65 = vadd.xlane.f32.xlu0 %v500_v0  ;;  %v301_v10 = vld [vmem:[#allocation7] sm:$0xff]   ;;  %271 = vmatprep.subr.bf16.mxu0 %v418_v11  ;;  %v302_v12 = vld [vmem:[#allocation7 + $0x8] sm:$0xff]   ;;  %v303_v13 = vld [vmem:[#allocation7 + $0x10] sm:$0xff]  }
  0x39   :  { %272 = vmatpush3.bf16.msra.mxu0 %v301_v10  ;;  %v304_v14 = vld [vmem:[#allocation7 + $0x18] sm:$0xff]   ;;  %v305_v15 = vld [vmem:[#allocation7 + $0x20] sm:$0xff]   ;;  %287 = vmatprep.mubr.msk.bf16.mxu0 %vm419_vm0, %v418_v11  ;;  %v306_v16 = vld [vmem:[#allocation7 + $0x28] sm:$0xff]  }
  0x3a   :  { %273 = vmatprep.subr.bf16.mxu0 %v418_v11  ;;  %v307_v17 = vld [vmem:[#allocation7 + $0x30] sm:$0xff]   ;;  %v308_v18 = vld [vmem:[#allocation7 + $0x38] sm:$0xff]   ;;  %v252_v35 = vld [vmem:[%s533_s2] ss:$0 sm:$0xff]  ;;  %s420_s2 = smov [#allocation8]  }
  0x3b   :  { %v253_v43 = vld [vmem:[%s535_s4] ss:$0 sm:$0xff]  ;;  %v226_v45 = vld [vmem:[#allocation5] sm:$0xff]  ;;  %v227_v49 = vld [vmem:[#allocation5 + $0x8] sm:$0xff]  ;;  %s239_s11 = sshll.u32 %s420_s2, 4  ;;  %s240_s11 = int_to_ptr.vmem [resolvable:$true] %s239_s11 }
  0x3c   :  { %67 = vadd.xlane.f32.xlu0 %v502_v1  ;;  %s383_s4 = scalar_lea.vmem %s240_s11, 256  ;;  %p388_p11 = scmp.lt.s32.totalorder %s240_s11, %s240_s11 }
  0x3d   :  { %274 = vmatpush3.bf16.msra.mxu0 %v302_v12  ;;  %p384_p10 = scmp.ne.s32.totalorder %s240_s11, %s383_s4  ;;  %p389_p12 = scmp.lt.s32.totalorder %s383_s4, %s383_s4 }
  0x3e   :  { %275 = vmatprep.subr.bf16.mxu0 %v418_v11 }
  0x3f   :  { %p390_p13 = por %p389_p12, %p388_p11 }
  0x41   :  { %276 = vmatpush3.bf16.msra.mxu0 %v303_v13  ;;  %p391_p0 = pnand %p390_p13, %p384_p10 }
  0x42   :  { %277 = vmatprep.subr.bf16.mxu0 %v418_v11 }
  0x45   :  { %278 = vmatpush3.bf16.msra.mxu0 %v304_v14 }
  0x46   :  { %279 = vmatprep.subr.bf16.mxu0 %v418_v11 }
  0x49   :  { %280 = vmatpush3.bf16.msra.mxu0 %v305_v15 }
  0x4a   :  { %281 = vmatprep.subr.bf16.mxu0 %v418_v11 }
  0x4d   :  { %282 = vmatpush3.bf16.msra.mxu0 %v306_v16 }
  0x4e   :  { %283 = vmatprep.subr.bf16.mxu0 %v418_v11 }
  0x51   :  { %284 = vmatpush3.bf16.msra.mxu0 %v307_v17 }
  0x52   :  { %285 = vmatprep.subr.bf16.mxu0 %v418_v11 }
  0x55   :  { %286 = vmatpush3.bf16.msra.mxu0 %v308_v18 }
  0xc5   :  { %v66_v2 = vpop.xlane.xlu0 %65 }
  0xc6   :  { %v70_v3 = vmul.f32 0.0078125, %v66_v2 }
  0xc8   :  { %v72_v4 = vsub.f32 %v500_v0, %v70_v3 }
  0xc9   :  { %v68_v5 = vpop.xlane.xlu0 %67 }
  0xca   :  { %v71_v6 = vmul.f32 0.0078125, %v68_v5  ;;  %v74_v7 = vmul.f32 %v72_v4, %v72_v4  ;;  %v109_v38 = vmul.f32 %v252_v35, %v72_v4 }
  0xcc   :  { %v73_v8 = vsub.f32 %v502_v1, %v71_v6  ;;  %76 = vadd.xlane.f32.xlu1 %v74_v7 }
  0xce   :  { %v75_v9 = vmul.f32 %v73_v8, %v73_v8  ;;  %v110_v37 = vmul.f32 %v252_v35, %v73_v8 }
  0xd0   :  { %78 = vadd.xlane.f32.xlu1 %v75_v9 }
 0x159   :  { %v77_v19 = vpop.xlane.xlu1 %76 }
 0x15a   :  { %v80_v20 = vmul.f32 0.007874016, %v77_v19 }
 0x15c   :  { %309 = vrsqrt.f32 %v80_v20  ;;  %vm84_vm1 = vcmp.eq.f32.partialorder %v80_v20, inf  ;;  %v87_v25 = vand.u32 2147483648, %v80_v20  ;;  %vm86_vm2 = vcmp.eq.f32.partialorder %v80_v20, 0.0 }
 0x15d   :  { %v79_v21 = vpop.xlane.xlu1 %78 }
 0x15e   :  { %v81_v22 = vmul.f32 0.007874016, %v79_v21 }
 0x160   :  { %311 = vrsqrt.f32 %v81_v22  ;;  %vm91_vm3 = vcmp.eq.f32.partialorder %v81_v22, inf  ;;  %v94_v31 = vand.u32 2147483648, %v81_v22  ;;  %vm93_vm4 = vcmp.eq.f32.partialorder %v81_v22, 0.0 }
 0x166   :  { %v310_v23 = vpop.eup %309 }
 0x167   :  { %v83_v24 = vmul.f32 %v310_v23, %v80_v20 }
 0x169   :  { %v85_v26 = vsel %vm84_vm1, %v80_v20, %v83_v24 }
 0x16a   :  { %v312_v27 = vpop.eup %311  ;;  %v88_v28 = vsel %vm86_vm2, %v87_v25, %v85_v26 }
 0x16b   :  { %v90_v29 = vmul.f32 %v312_v27, %v81_v22  ;;  %v96_v30 = vadd.f32 1e-06, %v88_v28 }
 0x16d   :  { %v92_v32 = vsel %vm91_vm3, %v81_v22, %v90_v29  ;;  %313 = vrcp.f32 %v96_v30 }
 0x16e   :  { %v95_v33 = vsel %vm93_vm4, %v94_v31, %v92_v32 }
 0x16f   :  { %v97_v34 = vadd.f32 1e-06, %v95_v33 }
 0x171   :  { %315 = vrcp.f32 %v97_v34 }
 0x177   :  { %v314_v36 = vpop.eup %313 }
 0x178   :  { %v111_v40 = vmul.f32 %v314_v36, %v109_v38 }
 0x17b   :  { %v316_v39 = vpop.eup %315 }
 0x17c   :  { %v112_v41 = vmul.f32 %v316_v39, %v110_v37 }
 0x17e   :  { %v113_v42 = vpack.c.bf16 %v112_v41, %v111_v40 }
 0x180   :  { %288 = vmatmul.mubr.bf16.vlgmr.msra.gmra.mrb[0].mxu0 %v113_v42 }
 0x253   :  { %v219_v44 = vpop.f32.mrb[0].mxu0 }
 0x254   :  { %v220_v46 = vadd.f32 %v253_v43, %v219_v44  ;;  %v289_v47 = vpop.f32.mrb[1].mxu0 }
 0x255   :  { %v222_v48 = vpop.f32.mrb[2].mxu0 }
 0x256   :  { %v228_v50 = vmul.f32 %v226_v45, %v220_v46  ;;  %v223_v51 = vadd.f32 %v253_v43, %v222_v48  ;;  %v290_v52 = vpop.f32.mrb[3].mxu0 }
 0x258   :  { %v230_v53 = vadd.f32 %v228_v50, %v500_v0  ;;  %v229_v54 = vmul.f32 %v227_v49, %v223_v51 }
 0x25a   :  { %232 = vst [vmem:[#allocation8] sm:$0xff] %v230_v53  ;;  %v231_v55 = vadd.f32 %v229_v54, %v502_v1 }
 0x25c   :  { %233 = vst [vmem:[#allocation8 + $0x8] sm:$0xff] %v231_v55 }
 0x25d   :  { %394 = shalt.err (!%p391_p0)
}
 0x25e   :  { %s395_s14 = scalar_lea.hbm %s536_s5, 256 }
 0x25f   :  { %p396_p1 = scmp.ne.s32.totalorder %s536_s5, %s395_s14  ;;  %p399_p2 = scmp.lt.u32.totalorder %s395_s14, %s536_s5 }
 0x261   :  { %p401_p3 = pnand %p399_p2, %p396_p1 }
 0x263   :  { %404 = shalt.err (!%p401_p3)
}
 0x264   :  { %245 = dma.vmem_to_hbm [thread:$0]  %s240_s11, 256, %s536_s5, [#allocation4], %s413_s30, %s413_s30, %s414_s6  }
 0x265   :  { %409 = dma.done.wait [#allocation4], 256  }
 0x266   :  { %410 = vsyncadd [#allocation4], 4294967040 }
 0x267   :  { %249 = vsyncpa [#allocation3], 1 }
 0x268   :  { %250 = vsyncpa [#allocation6], 1 }
 0x269   :  { %251 = vsyncpa [#allocation4], 1 }

</bundles_post_ra>
